<compile_context>
chip_gen: v6e
topology: v6e:2x2x1
jax: 0.10.0
libtpu: 0.0.40
codegen_flags: <defaults>
</compile_context>

<pallas_src>
import functools
import math

import jax
import jax.numpy as jnp
from jax.experimental import pallas as pl
from jax.experimental.pallas import tpu as pltpu

BN_EPS = 1e-5


def _round_up(x, m):
    return (x + m - 1) // m * m


def _pick_row_tile(M, cap=512, min_tiles=2):
    """Largest divisor of M (multiple of 8, or M itself) <= cap; prefer >=2 tiles."""
    cands = [d for d in range(1, min(M, cap) + 1)
             if M % d == 0 and (d % 8 == 0 or d == M)]
    multi = [d for d in cands if M // d >= min_tiles]
    if multi:
        return max(multi), 0
    if cands:
        return max(cands), 0
    t = 256                                 # rare fallback: pad to a 256-row tile
    return t, _round_up(M, t) - M


def _pick_k_chunks(K, max_chunk=1024, threshold=2048, max_chunks=16):
    """Number of K chunks (each a multiple of 128) for large-K matmuls."""
    if K <= threshold:
        return 1
    for nk in range(2, max_chunks + 1):
        if K % nk == 0 and K // nk <= max_chunk and (K // nk) % 128 == 0:
            return nk
    return 1


# ----------------------------------------------------------------------------
# Pallas kernels
# ----------------------------------------------------------------------------

def matmul_fused(a, b, *, scale=None, shift=None, residual=None, relu=False,
                 out_dtype=jnp.bfloat16):
    """(M,K) @ (K,N) with fused per-column affine / bias / residual / ReLU.

    bf16 operands, f32 MXU accumulation, f32 epilogue, bf16 (default) store.
    K is tiled ("arbitrary" axis + accumulator scratch) when K > 2048; M uses
    divisor tiles (no padding, >=2 tiles so megacore can split); N <= 512 here
    so it is never tiled and the weight block index is constant when nk == 1.
    """
    M, K = a.shape
    K2, N = b.shape
    assert K == K2
    a = a.astype(jnp.bfloat16)
    b = b.astype(jnp.bfloat16)

    nk = _pick_k_chunks(K)
    tk = K // nk
    tm, m_pad = _pick_row_tile(M, cap=512)
    if m_pad:
        a = jnp.pad(a, ((0, m_pad), (0, 0)))
    Mp = M + m_pad
    mt = Mp // tm

    has_scale = scale is not None
    has_shift = shift is not None
    has_res = residual is not None

    inputs = [a, b]
    in_specs = [pl.BlockSpec((tm, tk), lambda i, k: (i, k)),
                pl.BlockSpec((tk, N), lambda i, k: (k, 0))]
    if has_scale:
        inputs.append(scale.reshape(1, N).astype(jnp.float32))
        in_specs.append(pl.BlockSpec((1, N), lambda i, k: (0, 0)))
    if has_shift:
        inputs.append(shift.reshape(1, N).astype(jnp.float32))
        in_specs.append(pl.BlockSpec((1, N), lambda i, k: (0, 0)))
    if has_res:
        r = residual.reshape(M, N).astype(jnp.bfloat16)
        if m_pad:
            r = jnp.pad(r, ((0, m_pad), (0, 0)))
        inputs.append(r)
        in_specs.append(pl.BlockSpec((tm, N), lambda i, k: (i, 0)))
    n_in = len(inputs)

    def epilogue(acc, refs):
        idx = 2
        if has_scale:
            acc = acc * refs[idx][...]
            idx += 1
        if has_shift:
            acc = acc + refs[idx][...]
            idx += 1
        if has_res:
            acc = acc + refs[idx][...].astype(jnp.float32)
            idx += 1
        if relu:
            acc = jnp.maximum(acc, 0.0)
        return acc

    if nk == 1:
        def kernel(*refs):
            a_ref, b_ref, o_ref = refs[0], refs[1], refs[n_in]
            acc = jnp.dot(a_ref[...], b_ref[...],
                          preferred_element_type=jnp.float32)
            o_ref[...] = epilogue(acc, refs).astype(o_ref.dtype)
        scratch = []
    else:
        def kernel(*refs):
            a_ref, b_ref, o_ref = refs[0], refs[1], refs[n_in]
            acc_ref = refs[n_in + 1]

            @pl.when(pl.program_id(1) == 0)
            def _():
                acc_ref[...] = jnp.zeros_like(acc_ref)

            acc_ref[...] += jnp.dot(a_ref[...], b_ref[...],
                                    preferred_element_type=jnp.float32)

            @pl.when(pl.program_id(1) == nk - 1)
            def _():
                o_ref[...] = epilogue(acc_ref[...], refs).astype(o_ref.dtype)
        scratch = [pltpu.VMEM((tm, N), jnp.float32)]

    out = pl.pallas_call(
        kernel,
        out_shape=jax.ShapeDtypeStruct((Mp, N), out_dtype),
        grid_spec=pltpu.PrefetchScalarGridSpec(
            num_scalar_prefetch=0,
            grid=(mt, nk),
            in_specs=in_specs,
            out_specs=pl.BlockSpec((tm, N), lambda i, k: (i, 0)),
            scratch_shapes=scratch),
        compiler_params=pltpu.CompilerParams(
            dimension_semantics=("parallel", "arbitrary"),
            vmem_limit_bytes=32 * 1024 * 1024),
    )(*inputs)
    return out[:M] if m_pad else out


def _tcn_kernel(x_ref, sc1_ref, sh1_ref, w_ref, sc2_ref, sh2_ref, o_ref, *, alpha):
    """ReLU -> BN1 affine -> depthwise conv1d(k=3, pad=1) -> PReLU -> BN2 affine."""
    x = x_ref[0].astype(jnp.float32)                         # (T, C)
    a = jnp.maximum(x, 0.0) * sc1_ref[...] + sh1_ref[...]
    w = w_ref[...]                                           # (3, C) f32
    zero = jnp.zeros_like(a[:1])
    a_prev = jnp.concatenate([zero, a[:-1]], axis=0)         # x[t-1]
    a_next = jnp.concatenate([a[1:], zero], axis=0)          # x[t+1]
    d = w[0:1] * a_prev + w[1:2] * a + w[2:3] * a_next
    p = jnp.where(d >= 0.0, d, alpha * d)
    o_ref[0] = (p * sc2_ref[...] + sh2_ref[...]).astype(o_ref.dtype)


def tcn_stage_pallas(x, sc1, sh1, dw_w, alpha, sc2, sh2):
    """Fused inner chain of one DSConv1d block on (B, T, C)."""
    B, T, C = x.shape
    f32 = jnp.float32
    return pl.pallas_call(
        functools.partial(_tcn_kernel, alpha=float(alpha)),
        out_shape=jax.ShapeDtypeStruct((B, T, C), jnp.bfloat16),
        grid_spec=pltpu.PrefetchScalarGridSpec(
            num_scalar_prefetch=0, grid=(B,),
            in_specs=[pl.BlockSpec((1, T, C), lambda b: (b, 0, 0)),
                      pl.BlockSpec((1, C), lambda b: (0, 0)),
                      pl.BlockSpec((1, C), lambda b: (0, 0)),
                      pl.BlockSpec((3, C), lambda b: (0, 0)),
                      pl.BlockSpec((1, C), lambda b: (0, 0)),
                      pl.BlockSpec((1, C), lambda b: (0, 0))],
            out_specs=pl.BlockSpec((1, T, C), lambda b: (b, 0, 0))),
        compiler_params=pltpu.CompilerParams(dimension_semantics=("parallel",)),
    )(x.astype(jnp.bfloat16),
      sc1.reshape(1, C).astype(f32), sh1.reshape(1, C).astype(f32),
      dw_w.reshape(3, C).astype(f32),
      sc2.reshape(1, C).astype(f32), sh2.reshape(1, C).astype(f32))


def _attn_layer_kernel(src_ref, tar_ref, wq_ref, bq_ref, wk_ref, bk_ref,
                       wv_ref, bv_ref, wo_ref, bo_ref, w1_ref, b1_ref,
                       w2_ref, b2_ref, g1_ref, be1_ref, g2_ref, be2_ref,
                       o_ref, *, nhead, scale, eps):
    """Full attentionLayer for one batch element:
       MHA(q=tar, k=v=src) + residual(src) + LN1 + FFN + residual + LN2."""
    src = src_ref[0]                                         # (T, D) bf16
    tar = tar_ref[0]
    T, D = src.shape

    attn = jnp.zeros((T, D), jnp.float32) + bo_ref[...]
    for h in range(nhead):
        q = jnp.dot(tar, wq_ref[h], preferred_element_type=jnp.float32) + bq_ref[h]
        k = jnp.dot(src, wk_ref[h], preferred_element_type=jnp.float32) + bk_ref[h]
        v = jnp.dot(src, wv_ref[h], preferred_element_type=jnp.float32) + bv_ref[h]
        s = jax.lax.dot_general(
            (q * scale).astype(jnp.bfloat16), k.astype(jnp.bfloat16),
            (((1,), (1,)), ((), ())), preferred_element_type=jnp.float32)
        s = s - jnp.max(s, axis=-1, keepdims=True)
        p = jnp.exp(s)
        p = p / jnp.sum(p, axis=-1, keepdims=True)
        o_h = jnp.dot(p.astype(jnp.bfloat16), v.astype(jnp.bfloat16),
                      preferred_element_type=jnp.float32)
        attn = attn + jnp.dot(o_h.astype(jnp.bfloat16), wo_ref[h],
                              preferred_element_type=jnp.float32)

    x = src.astype(jnp.float32) + attn
    mu = jnp.mean(x, axis=-1, keepdims=True)
    xc = x - mu
    var = jnp.mean(xc * xc, axis=-1, keepdims=True)
    x = xc * jax.lax.rsqrt(var + eps) * g1_ref[...] + be1_ref[...]

    h1 = jnp.dot(x.astype(jnp.bfloat16), w1_ref[...],
                 preferred_element_type=jnp.float32) + b1_ref[...]
    h1 = jnp.maximum(h1, 0.0)
    h2 = jnp.dot(h1.astype(jnp.bfloat16), w2_ref[...],
                 preferred_element_type=jnp.float32) + b2_ref[...]
    x = x + h2
    mu = jnp.mean(x, axis=-1, keepdims=True)
    xc = x - mu
    var = jnp.mean(xc * xc, axis=-1, keepdims=True)
    x = xc * jax.lax.rsqrt(var + eps) * g2_ref[...] + be2_ref[...]
    o_ref[0] = x.astype(o_ref.dtype)


def attention_layer_fwd(p, src, tar):
    """One fused pallas_call per attention layer, gridded over batch."""
    B, T, D = src.shape
    H = p["nhead"]
    dh = D // H
    f32 = jnp.float32

    wq = p["wq"].reshape(D, H, dh).transpose(1, 0, 2)        # (H, D, dh) bf16
    wk = p["wk"].reshape(D, H, dh).transpose(1, 0, 2)
    wv = p["wv"].reshape(D, H, dh).transpose(1, 0, 2)
    wo = p["wo"].reshape(H, dh, D)                           # (H, dh, D) bf16
    bq = p["bq"].reshape(H, 1, dh).astype(f32)
    bk = p["bk"].reshape(H, 1, dh).astype(f32)
    bv = p["bv"].reshape(H, 1, dh).astype(f32)
    bo = p["bo"].reshape(1, D).astype(f32)
    b1 = p["b1"].reshape(1, 4 * D).astype(f32)
    b2 = p["b2"].reshape(1, D).astype(f32)
    g1 = p["ln1_g"].reshape(1, D).astype(f32)
    be1 = p["ln1_b"].reshape(1, D).astype(f32)
    g2 = p["ln2_g"].reshape(1, D).astype(f32)
    be2 = p["ln2_b"].reshape(1, D).astype(f32)

    def const_spec(arr):
        n = arr.ndim
        return pl.BlockSpec(arr.shape, lambda b, n=n: (0,) * n)

    seq_spec = pl.BlockSpec((1, T, D), lambda b: (b, 0, 0))
    inputs = [src.astype(jnp.bfloat16), tar.astype(jnp.bfloat16),
              wq, bq, wk, bk, wv, bv, wo, bo,
              p["w1"], b1, p["w2"], b2, g1, be1, g2, be2]
    in_specs = [seq_spec, seq_spec] + [const_spec(x) for x in inputs[2:]]

    return pl.pallas_call(
        functools.partial(_attn_layer_kernel, nhead=H,
                          scale=1.0 / math.sqrt(dh), eps=1e-5),
        out_shape=jax.ShapeDtypeStruct((B, T, D), jnp.bfloat16),
        grid_spec=pltpu.PrefetchScalarGridSpec(
            num_scalar_prefetch=0, grid=(B,),
            in_specs=in_specs,
            out_specs=pl.BlockSpec((1, T, D), lambda b: (b, 0, 0))),
        compiler_params=pltpu.CompilerParams(dimension_semantics=("parallel",)),
    )(*inputs)


# ----------------------------------------------------------------------------
# NN building blocks (im2col / pooling glue in JAX, contraction + epilogue in Pallas)
# ----------------------------------------------------------------------------

def conv2d(x, w, stride=(1, 1), padding=(0, 0), scale=None, shift=None,
           residual=None, relu=False):
    """x: (N,H,W,Cin); w: (kh,kw,Cin,Cout) bf16.  Fused BN/bias/res/ReLU epilogue."""
    # TODO(synk): patches are still materialized via im2col in HBM (kh*kw-fold
    # activation duplication); a direct-conv kernel with halo DMA would remove it.
    N, H, W, Cin = x.shape
    kh, kw, _, Cout = w.shape
    sh, sw = stride
    ph, pw = padding
    Ho = (H + 2 * ph - kh) // sh + 1
    Wo = (W + 2 * pw - kw) // sw + 1
    xb = x.astype(jnp.bfloat16)
    if kh == 1 and kw == 1 and ph == 0 and pw == 0:
        patches = xb[:, ::sh, ::sw, :][:, :Ho, :Wo, :]            # 1x1: no im2col
    else:
        xp = jnp.pad(xb, ((0, 0), (ph, ph), (pw, pw), (0, 0)))
        cols = [xp[:, i:i + sh * Ho:sh, j:j + sw * Wo:sw, :]
                for i in range(kh) for j in range(kw)]
        patches = jnp.concatenate(cols, axis=-1)                  # (N,Ho,Wo,kh*kw*Cin)
    res2d = None if residual is None else residual.reshape(N * Ho * Wo, Cout)
    y = matmul_fused(patches.reshape(N * Ho * Wo, kh * kw * Cin),
                     w.reshape(kh * kw * Cin, Cout),
                     scale=scale, shift=shift, residual=res2d, relu=relu)
    return y.reshape(N, Ho, Wo, Cout)


def conv1d(x, w, padding=0, scale=None, shift=None, residual=None, relu=False):
    """x: (B,T,Cin); w: (k,Cin,Cout) bf16."""
    B, T, Cin = x.shape
    k, _, Cout = w.shape
    To = T + 2 * padding - k + 1
    xb = x.astype(jnp.bfloat16)
    if k == 1 and padding == 0:
        patches = xb
    else:
        xp = jnp.pad(xb, ((0, 0), (padding, padding), (0, 0)))
        patches = jnp.concatenate([xp[:, i:i + To, :] for i in range(k)], axis=-1)
    res2d = None if residual is None else residual.reshape(B * To, Cout)
    y = matmul_fused(patches.reshape(B * To, k * Cin), w.reshape(k * Cin, Cout),
                     scale=scale, shift=shift, residual=res2d, relu=relu)
    return y.reshape(B, To, Cout)


def maxpool2d(x, k=3, s=2, p=1):
    # TODO(synk): max-pool window reduction kept as plain JAX glue.
    N, H, W, C = x.shape
    xp = jnp.pad(x, ((0, 0), (p, p), (p, p), (0, 0)), constant_values=-jnp.inf)
    Ho = (H + 2 * p - k) // s + 1
    Wo = (W + 2 * p - k) // s + 1
    out = None
    for i in range(k):
        for j in range(k):
            win = xp[:, i:i + s * Ho:s, j:j + s * Wo:s, :]
            out = win if out is None else jnp.maximum(out, win)
    return out


def bn_affine(bn):
    """Eval-mode BN with default running stats (mean=0, var=1) -> (scale, shift)."""
    inv = 1.0 / math.sqrt(1.0 + BN_EPS)
    return bn["g"] * inv, bn["b"]


def linear(x, w, b=None, out_dtype=jnp.float32):
    shp = x.shape
    y = matmul_fused(x.reshape(-1, shp[-1]), w, shift=b, out_dtype=out_dtype)
    return y.reshape(shp[:-1] + (w.shape[-1],))


# ----------------------------------------------------------------------------
# Deterministic parameter construction (weights pre-cast to bf16 once)
# ----------------------------------------------------------------------------

class ParamInit:
    def __init__(self, seed=0):
        self._key = jax.random.PRNGKey(seed)
        self._n = 0

    def next(self):
        self._n += 1
        return jax.random.fold_in(self._key, self._n)

    def conv(self, kh, kw, cin, cout):
        fan_in = kh * kw * cin
        w = (jax.random.normal(self.next(), (kh, kw, cin, cout), jnp.float32)
             * math.sqrt(2.0 / fan_in))
        return w.astype(jnp.bfloat16)

    def dense(self, cin, cout):
        w = (jax.random.normal(self.next(), (cin, cout), jnp.float32)
             * math.sqrt(1.0 / cin)).astype(jnp.bfloat16)
        b = jnp.zeros((cout,), jnp.float32)
        return w, b

    @staticmethod
    def bn(c):
        return {"g": jnp.ones((c,), jnp.float32), "b": jnp.zeros((c,), jnp.float32)}


def make_visual_frontend(init):
    w3 = (jax.random.normal(init.next(), (5, 7, 7, 1, 64), jnp.float32)
          * math.sqrt(2.0 / (5 * 7 * 7))).astype(jnp.bfloat16)
    p = {"conv3d_w": w3, "bn3d": init.bn(64)}
    blocks = []
    cin = 64
    for nf, nb, st in zip((64, 128, 256, 512), (2, 2, 2, 2), (1, 2, 2, 2)):
        for bi in range(nb):
            s = st if bi == 0 else 1
            bp = {"w1": init.conv(3, 3, cin, nf), "bn1": init.bn(nf),
                  "w2": init.conv(3, 3, nf, nf), "bn2": init.bn(nf),
                  "stride": s}
            if s != 1 or cin != nf:
                bp["dw"] = init.conv(1, 1, cin, nf)
                bp["dbn"] = init.bn(nf)
            blocks.append(bp)
            cin = nf
    p["resnet"] = blocks
    return p


def make_visual_tcn(init, c=512, n=5):
    blocks = []
    for _ in range(n):
        blocks.append({
            "bn1": init.bn(c),
            "dw_w": jax.random.normal(init.next(), (3, c), jnp.float32)
                    * math.sqrt(2.0 / 3.0),
            "prelu_a": 0.25,
            "bn2": init.bn(c),
            "pw_w": (jax.random.normal(init.next(), (1, c, c), jnp.float32)
                     * math.sqrt(2.0 / c)).astype(jnp.bfloat16),
        })
    return blocks


def make_visual_conv1d(init):
    w1 = (jax.random.normal(init.next(), (5, 512, 256), jnp.float32)
          * math.sqrt(2.0 / (5 * 512))).astype(jnp.bfloat16)
    w2 = (jax.random.normal(init.next(), (1, 256, 128), jnp.float32)
          * math.sqrt(2.0 / 256)).astype(jnp.bfloat16)
    return {"w1": w1, "b1": jnp.zeros((256,), jnp.float32), "bn": init.bn(256),
            "w2": w2, "b2": jnp.zeros((128,), jnp.float32)}


def make_audio_encoder(init, layers=(3, 4, 6, 3), filters=(16, 32, 64, 128)):
    p = {"conv1_w": init.conv(7, 7, 1, filters[0]), "bn1": init.bn(filters[0])}
    strides = ((1, 1), (2, 2), (2, 2), (1, 1))
    blocks = []
    cin = filters[0]
    for nf, nb, st in zip(filters, layers, strides):
        for bi in range(nb):
            s = st if bi == 0 else (1, 1)
            bp = {"w1": init.conv(3, 3, cin, nf), "bn1": init.bn(nf),
                  "w2": init.conv(3, 3, nf, nf), "bn2": init.bn(nf),
                  "stride": s}
            hid = max(nf // 8, 1)
            bp["se_w1"], bp["se_b1"] = init.dense(nf, hid)
            bp["se_w2"], bp["se_b2"] = init.dense(hid, nf)
            if s != (1, 1) or cin != nf:
                bp["dw"] = init.conv(1, 1, cin, nf)
                bp["dbn"] = init.bn(nf)
            blocks.append(bp)
            cin = nf
    p["blocks"] = blocks
    return p


def make_attention_layer(init, d, nhead=8):
    wq, bq = init.dense(d, d)
    wk, bk = init.dense(d, d)
    wv, bv = init.dense(d, d)
    wo, bo = init.dense(d, d)
    w1, b1 = init.dense(d, d * 4)
    w2, b2 = init.dense(d * 4, d)
    return {"wq": wq, "bq": bq, "wk": wk, "bk": bk, "wv": wv, "bv": bv,
            "wo": wo, "bo": bo, "w1": w1, "b1": b1, "w2": w2, "b2": b2,
            "ln1_g": jnp.ones((d,), jnp.float32), "ln1_b": jnp.zeros((d,), jnp.float32),
            "ln2_g": jnp.ones((d,), jnp.float32), "ln2_b": jnp.zeros((d,), jnp.float32),
            "nhead": nhead}


def make_talknet_params(seed=0):
    init = ParamInit(seed)
    return {
        "visual": make_visual_frontend(init),
        "tcn": make_visual_tcn(init),
        "vconv": make_visual_conv1d(init),
        "audio": make_audio_encoder(init),
        "crossA2V": make_attention_layer(init, 128),
        "crossV2A": make_attention_layer(init, 128),
        "selfAV": make_attention_layer(init, 256),
        "fcAV": init.dense(256, 2),
        "fcA": init.dense(128, 2),
        "fcV": init.dense(128, 2),
    }


# ----------------------------------------------------------------------------
# Forward pass
# ----------------------------------------------------------------------------

def basic_block_fwd(bp, x):
    s = bp["stride"]
    st = (s, s) if isinstance(s, int) else s
    sc1, sh1 = bn_affine(bp["bn1"])
    sc2, sh2 = bn_affine(bp["bn2"])
    if "dw" in bp:
        dsc, dsh = bn_affine(bp["dbn"])
        res = conv2d(x, bp["dw"], stride=st, padding=(0, 0), scale=dsc, shift=dsh)
    else:
        res = x
    out = conv2d(x, bp["w1"], stride=st, padding=(1, 1),
                 scale=sc1, shift=sh1, relu=True)
    if "se_w1" in bp:
        # Squeeze-and-excitation: tensors are tiny (<= a few KiB per step), so
        # the whole tail is plain JAX (one fused XLA elementwise pass) instead
        # of several near-empty pallas_calls.
        out = conv2d(out, bp["w2"], stride=(1, 1), padding=(1, 1),
                     scale=sc2, shift=sh2)
        s_vec = jnp.mean(out.astype(jnp.float32), axis=(1, 2))        # (N, C)
        s_vec = jax.nn.relu(s_vec @ bp["se_w1"].astype(jnp.float32) + bp["se_b1"])
        s_vec = jax.nn.sigmoid(s_vec @ bp["se_w2"].astype(jnp.float32) + bp["se_b2"])
        out = jnp.maximum(out.astype(jnp.float32) * s_vec[:, None, None, :]
                          + res.astype(jnp.float32), 0.0).astype(jnp.bfloat16)
    else:
        # bn2 + residual add + ReLU fused into the conv2 matmul epilogue.
        out = conv2d(out, bp["w2"], stride=(1, 1), padding=(1, 1),
                     scale=sc2, shift=sh2, residual=res, relu=True)
    return out


def visual_frontend_fwd(p, x):
    """x: (B, T, W, H) raw pixels -> (B, T, 512)."""
    B, T, W, H = x.shape
    x = x.reshape(B * T, W, H, 1).astype(jnp.float32)
    x = (x / 255.0 - 0.4161) / 0.1688
    # Conv3d(1,64,(5,7,7),s=(1,2,2),p=(2,3,3)) on single-frame clips (time dim==1):
    # only the center temporal tap touches real data -> exact 2D conv with w[2].
    sc, sh = bn_affine(p["bn3d"])
    x = conv2d(x, p["conv3d_w"][2], stride=(2, 2), padding=(3, 3),
               scale=sc, shift=sh, relu=True)
    x = maxpool2d(x, 3, 2, 1)                           # MaxPool3d (1,3,3)/(1,2,2)
    for bp in p["resnet"]:
        x = basic_block_fwd(bp, x)
    x = jnp.mean(x.astype(jnp.float32), axis=(1, 2))    # global spatial avg pool
    return x.reshape(B, T, 512)


def visual_tcn_fwd(blocks, x):
    """5x DSConv1d residual blocks on (B, T, 512)."""
    for bp in blocks:
        sc1, sh1 = bn_affine(bp["bn1"])
        sc2, sh2 = bn_affine(bp["bn2"])
        out = tcn_stage_pallas(x, sc1, sh1, bp["dw_w"], bp["prelu_a"], sc2, sh2)
        x = conv1d(out, bp["pw_w"], residual=x)          # 1x1 pointwise + residual
    return x


def visual_conv1d_fwd(p, x):
    sc, sh = bn_affine(p["bn"])
    # conv bias folded with BN affine: (y+b)*sc+sh = y*sc + (b*sc+sh)
    x = conv1d(x, p["w1"], padding=2, scale=sc, shift=p["b1"] * sc + sh, relu=True)
    x = conv1d(x, p["w2"], padding=0, shift=p["b2"])     # 256 -> 128, k=1
    return x


def audio_frontend_fwd(p, audioX):
    """audioX: (B, 4T, 13) MFCC -> (B, T, 128). NHWC with H=freq, W=time."""
    x = jnp.transpose(audioX, (0, 2, 1))[..., None].astype(jnp.float32)  # (B,13,4T,1)
    sc, sh = bn_affine(p["bn1"])
    x = conv2d(x, p["conv1_w"], stride=(2, 1), padding=(3, 3),
               scale=sc, shift=sh, relu=True)
    for bp in p["blocks"]:
        x = basic_block_fwd(bp, x)
    x = jnp.mean(x.astype(jnp.float32), axis=1)          # mean over freq -> (B, T, 128)
    return x


def talknet_forward(params, audioX, visualX):
    a = audio_frontend_fwd(params["audio"], audioX)            # (B, T, 128)
    v = visual_frontend_fwd(params["visual"], visualX)         # (B, T, 512)
    v = visual_tcn_fwd(params["tcn"], v)
    v = visual_conv1d_fwd(params["vconv"], v)                  # (B, T, 128)
    a_c = attention_layer_fwd(params["crossA2V"], src=a, tar=v)
    v_c = attention_layer_fwd(params["crossV2A"], src=v, tar=a)
    av = jnp.concatenate([a_c, v_c], axis=2)                   # (B, T, 256)
    av = attention_layer_fwd(params["selfAV"], src=av, tar=av)
    outAV = linear(av, *params["fcAV"])
    outA = linear(a_c, *params["fcA"])
    outV = linear(v_c, *params["fcV"])
    return outAV, outA, outV


# ----------------------------------------------------------------------------

if __name__ == "__main__":
    B, T = 2, 8            # batch, video frames
    W = H = 32             # face crop (small)
    Ta, F = 4 * T, 13      # audio MFCC frames (100fps vs 25fps) x 13 coeffs

    key = jax.random.PRNGKey(0)
    k1, k2 = jax.random.split(key)
    visualX = jax.random.uniform(k1, (B, T, W, H), jnp.float32, 0.0, 255.0)
    audioX = jax.random.normal(k2, (B, Ta, F), jnp.float32)

    params = make_talknet_params(seed=0)
    outAV, outA, outV = talknet_forward(params, audioX, visualX)
    jax.block_until_ready((outAV, outA, outV))

    assert outAV.shape == (B, T, 2), outAV.shape
    assert outA.shape == (B, T, 2), outA.shape
    assert outV.shape == (B, T, 2), outV.shape
    assert all(bool(jnp.all(jnp.isfinite(o))) for o in (outAV, outA, outV))
    print("KERNEL_OK")
</pallas_src>

<mosaic_0001>
module attributes {stable_mosaic.version = 11 : i64} {
  func.func @kernel(%arg0: i32, %arg1: i32, %arg2: memref<224x49xbf16, #tpu.memory_space<vmem>>, %arg3: memref<49x16xbf16, #tpu.memory_space<vmem>>, %arg4: memref<1x16xf32, #tpu.memory_space<vmem>>, %arg5: memref<1x16xf32, #tpu.memory_space<vmem>>, %arg6: memref<224x16xbf16, #tpu.memory_space<vmem>>) attributes {dimension_semantics = [#tpu.dimension_semantics<parallel>, #tpu.dimension_semantics<arbitrary>], iteration_bounds = array<i64: 2, 1>, scalar_prefetch = 0 : i64, scratch_operands = 0 : i64, tpu.core_type = #tpu.core_type<tc>, window_params = [{transform_indices = @transform_0, window_bounds = array<i64: 224, 49>}, {transform_indices = @transform_1, window_bounds = array<i64: 49, 16>}, {pipeline_mode = #tpu.pipeline_mode<synchronous>, transform_indices = @transform_2, window_bounds = array<i64: 1, 16>}, {pipeline_mode = #tpu.pipeline_mode<synchronous>, transform_indices = @transform_3, window_bounds = array<i64: 1, 16>}, {transform_indices = @transform_4, window_bounds = array<i64: 224, 16>}]} {
    %c0 = arith.constant 0 : index
    %c0_0 = arith.constant 0 : index
    %0 = vector.load %arg2[%c0, %c0_0] : memref<224x49xbf16, #tpu.memory_space<vmem>>, vector<224x49xbf16>
    %c0_1 = arith.constant 0 : index
    %c0_2 = arith.constant 0 : index
    %1 = vector.load %arg3[%c0_1, %c0_2] : memref<49x16xbf16, #tpu.memory_space<vmem>>, vector<49x16xbf16>
    %cst = arith.constant dense<0.000000e+00> : vector<224x16xf32>
    %2 = tpu.matmul %0, %1, %cst {dimension_numbers = #tpu.dot_dimension_numbers<[1], [0], [0], [1], [0, 0, 1, 1], [], []>} : vector<224x49xbf16>, vector<49x16xbf16>, vector<224x16xf32> -> vector<224x16xf32>
    %c0_3 = arith.constant 0 : index
    %c0_4 = arith.constant 0 : index
    %3 = vector.load %arg4[%c0_3, %c0_4] : memref<1x16xf32, #tpu.memory_space<vmem>>, vector<1x16xf32>
    %4 = vector.broadcast %3 : vector<1x16xf32> to vector<224x16xf32>
    %5 = arith.mulf %2, %4 : vector<224x16xf32>
    %c0_5 = arith.constant 0 : index
    %c0_6 = arith.constant 0 : index
    %6 = vector.load %arg5[%c0_5, %c0_6] : memref<1x16xf32, #tpu.memory_space<vmem>>, vector<1x16xf32>
    %7 = vector.broadcast %6 : vector<1x16xf32> to vector<224x16xf32>
    %8 = arith.addf %5, %7 : vector<224x16xf32>
    %cst_7 = arith.constant 0.000000e+00 : f32
    %9 = vector.broadcast %cst_7 : f32 to vector<224x16xf32>
    %10 = arith.maximumf %8, %9 : vector<224x16xf32>
    %11 = arith.truncf %10 : vector<224x16xf32> to vector<224x16xbf16>
    %c0_8 = arith.constant 0 : index
    %c0_9 = arith.constant 0 : index
    %12 = vector.load %arg6[%c0_8, %c0_9] : memref<224x16xbf16, #tpu.memory_space<vmem>>, vector<224x16xbf16>
    tpu.vector_store %arg6[%c0_8, %c0_9], %11 {strides = array<i32>} : memref<224x16xbf16, #tpu.memory_space<vmem>>, vector<224x16xbf16>,
    return
  }
  func.func @transform_0(%arg0: i32, %arg1: i32) -> (i32, i32) {
    %c0_i32 = arith.constant 0 : i32
    return %arg0, %arg1 : i32, i32
  }
  func.func @transform_1(%arg0: i32, %arg1: i32) -> (i32, i32) {
    %c0_i32 = arith.constant 0 : i32
    %c0_i32_0 = arith.constant 0 : i32
    return %arg1, %c0_i32 : i32, i32
  }
  func.func @transform_2(%arg0: i32, %arg1: i32) -> (i32, i32) {
    %c0_i32 = arith.constant 0 : i32
    %c0_i32_0 = arith.constant 0 : i32
    %c0_i32_1 = arith.constant 0 : i32
    return %c0_i32, %c0_i32_0 : i32, i32
  }
  func.func @transform_3(%arg0: i32, %arg1: i32) -> (i32, i32) {
    %c0_i32 = arith.constant 0 : i32
    %c0_i32_0 = arith.constant 0 : i32
    %c0_i32_1 = arith.constant 0 : i32
    return %c0_i32, %c0_i32_0 : i32, i32
  }
  func.func @transform_4(%arg0: i32, %arg1: i32) -> (i32, i32) {
    %c0_i32 = arith.constant 0 : i32
    %c0_i32_0 = arith.constant 0 : i32
    return %arg0, %c0_i32 : i32, i32
  }
}

</mosaic_0001>

<bundles_post_ra>
// kernel: tpu_custom_call.1
= control target key start
LH: loop header
LB: loop body
LE: loop exit
PB: predicated region body
PF: predicated region fallthrough
CT: control target
= control target key end

     0   :  { %s1144_s15 = smov 0   ;;  %s1146_s16 = smov 0   ;;  %s1350_s0 = inlined_call_operand.vmem [shape: bf16[448,49], index: 0, kind: input, shape index: {}]   ;;  %s1351_s1 = inlined_call_operand.vmem [shape: bf16[49,16], index: 1, kind: input, shape index: {}]   ;;  %s1352_s2 = inlined_call_operand.vmem [shape: f32[1,16], index: 2, kind: input, shape index: {}]   ;;  %s1353_s3 = inlined_call_operand.vmem [shape: f32[1,16], index: 3, kind: input, shape index: {}]   ;;  %s1354_s4 = inlined_call_operand.vmem [shape: bf16[448,16], index: 4, kind: output, shape index: {}]  }
   0x1   :  { %s1148_s17 = smov 0  }
   0x2 LB: > { %s26_s18 = sadd.s32 1, %s1112_s16  ;;  %p894_p0 = scmp.ge.s32.totalorder %s1116_s17, 1  ;;  %s1116_s17 = sphi %s1148_s17, %s14_s17   ;;  %s1112_s16 = sphi %s1146_s16, %s1356_s16   ;;  %s1108_s15 = sphi %s1144_s15, %s1355_s15  }
   0x3   : > { %p28_p1 = scmp.ge.s32.totalorder %s26_s18, 2  ;;  %p191_p2 = scmp.lt.s32.totalorder %s1116_s17, 3 }
   0x5   : > { %s1358_s18 = smov (%p28_p1, %s26_s18), 0  ;;  %p192_p3 = pnand %p894_p0, %p191_p2 }
   0x6   : > { %s225_s23 = smul.u32 (!%p192_p3), 28, %s1108_s15 }
   0x7   : > { %195 = sbr.rel (%p192_p3) target bundleno = 264 (0x108), region = 36 }
   0x8   : > { %p226_p4 = scmp.lt.s32.totalorder (!%p192_p3), %s225_s23, 55 }
   0xc   : > { %v1076_v0 = vld [vmem:[%s1351_s1 + $0x18] ss:$0 sps:$4 sm:$0x11]   ;;  %vm416_vm0 = vcmask 1040384   ;;  %v1118_v1 = vmov 0   ;;  %v1077_v4 = vld [vmem:[%s1351_s1 + $0x10] sm:$0xff]  }
   0xd   : > { %v418_v2 = vsel %vm416_vm0, 65535, %v1118_v1  ;;  %v1078_v5 = vld [vmem:[%s1351_s1 + $0x8] sm:$0xff]   ;;  %s1360_s23 = smov (!%p226_p4, %s225_s23), 55  ;;  %v1079_v6 = vld [vmem:[%s1351_s1] sm:$0xff]   ;;  %vm373_vm1 = vcmask 400384   ;;  %vm777_vm2 = vcmask 125952  }
   0xe   : > { %v420_v3 = vand.u32 %v1076_v0, %v418_v2  ;;  %s895_s26 = sshll.u32 %s1360_s23, 2  ;;  %v1215_v21 = vld [vmem:[%s1352_s2] ss:$0 sm:$0xff] }
   0xf   : > { %s1182_s5 = scalar_lea.vmem %s1350_s0, %s895_s26  ;;  %v1220_v23 = vld [vmem:[%s1353_s3] ss:$0 sm:$0xff]  ;;  %s1235_s12 = scalar_lea.vmem %s1354_s4, %s895_s26 }
  0x10   : > { %1007 = vmatprep.subr.bf16.mxu0 %v420_v3  ;;  %1043 = vmatprep.subr.bf16.mxu1 %v420_v3  ;;  %v1080_v7 = vld [vmem:[%s1182_s5] sm:$0xff]   ;;  %v1081_v9 = vld [vmem:[%s1182_s5 + $0x8] sm:$0xff]   ;;  %v1084_v11 = vld [vmem:[%s1182_s5 + $0x10] sm:$0xff]  }
  0x11   : > { %1008 = vmatpush3.bf16.msra.mxu0 %v420_v3  ;;  %1047 = vmatpush3.bf16.msra.mxu1 %v420_v3  ;;  %v1082_v8 = vld [vmem:[%s1182_s5 + $0x40] sm:$0xff]   ;;  %v1083_v10 = vld [vmem:[%s1182_s5 + $0x48] sm:$0xff]   ;;  %v1086_v12 = vld [vmem:[%s1182_s5 + $0x50] sm:$0xff]  }
  0x12   : > { %1009 = vmatprep.subr.bf16.mxu0 %v1077_v4  ;;  %1044 = vmatprep.subr.bf16.mxu1 %v1077_v4  ;;  %v1085_v13 = vld [vmem:[%s1182_s5 + $0x18] sm:$0xff]   ;;  %v1088_v15 = vld [vmem:[%s1182_s5 + $0x20] sm:$0xff]   ;;  %v1089_v17 = vld [vmem:[%s1182_s5 + $0x28] sm:$0xff]  }
  0x13   : > { %1015 = vmatprep.mubr.msk.bf16.mxu0 %vm373_vm1, %v1080_v7  ;;  %1031 = vmatprep.mubr.msk.bf16.mxu1 %vm373_vm1, %v1082_v8  ;;  %v1087_v14 = vld [vmem:[%s1182_s5 + $0x58] sm:$0xff]   ;;  %v1090_v16 = vld [vmem:[%s1182_s5 + $0x60] sm:$0xff]   ;;  %v1091_v18 = vld [vmem:[%s1182_s5 + $0x68] sm:$0xff]  }
  0x14   : > { %v1092_v19 = vld [vmem:[%s1182_s5 + $0x30] sm:$0xff]   ;;  %v1093_v20 = vld [vmem:[%s1182_s5 + $0x38] sm:$0xff]  }
  0x15   : > { %1010 = vmatpush3.bf16.msra.mxu0 %v1077_v4  ;;  %1048 = vmatpush3.bf16.msra.mxu1 %v1077_v4 }
  0x16   : > { %1011 = vmatprep.subr.bf16.mxu0 %v1078_v5  ;;  %1045 = vmatprep.subr.bf16.mxu1 %v1078_v5 }
  0x19   : > { %1012 = vmatpush3.bf16.msra.mxu0 %v1078_v5  ;;  %1049 = vmatpush3.bf16.msra.mxu1 %v1078_v5 }
  0x1a   : > { %1013 = vmatprep.subr.bf16.mxu0 %v1079_v6  ;;  %1046 = vmatprep.subr.bf16.mxu1 %v1079_v6 }
  0x1d   : > { %1014 = vmatpush3.bf16.msra.mxu0 %v1079_v6  ;;  %1050 = vmatpush3.bf16.msra.mxu1 %v1079_v6 }
  0x20   : > { %1016 = vmatmul.mubr.msk.bf16.vlgmr.msra.gmra.mxu0 %vm373_vm1, %v1081_v9  ;;  %1032 = vmatmul.mubr.msk.bf16.vlgmr.msra.gmra.mxu1 %vm373_vm1, %v1083_v10 }
  0x21   : > { %1019 = vmatprep.mubr.msk.bf16.mxu0 %vm373_vm1, %v1084_v11  ;;  %1035 = vmatprep.mubr.msk.bf16.mxu1 %vm373_vm1, %v1086_v12 }
  0x28   : > { %1020 = vmatmul.mubr.msk.bf16.gmra.mxu0 %vm373_vm1, %v1085_v13  ;;  %1036 = vmatmul.mubr.msk.bf16.gmra.mxu1 %vm373_vm1, %v1087_v14 }
  0x29   : > { %1023 = vmatprep.mubr.msk.bf16.mxu0 %vm373_vm1, %v1088_v15  ;;  %1039 = vmatprep.mubr.msk.bf16.mxu1 %vm373_vm1, %v1090_v16 }
  0x30   : > { %1024 = vmatmul.mubr.msk.bf16.gmra.mxu0 %vm373_vm1, %v1089_v17  ;;  %1040 = vmatmul.mubr.msk.bf16.gmra.mxu1 %vm373_vm1, %v1091_v18 }
  0x31   : > { %1027 = vmatprep.mubr.msk.bf16.mxu0 %vm373_vm1, %v1092_v19 }
  0x38   : > { %1028 = vmatmul.mubr.msk.bf16.gmra.mxu0 %vm373_vm1, %v1093_v20 }
  0xe0   : > { %v1017_v22 = vpop.f32.mrf.mxu0  ;;  %v1033_v24 = vpop.f32.mrf.mxu1 }
  0xe1   : > { %v576_v25 = vmul.f32 %v1017_v22, %v1215_v21  ;;  %v592_v26 = vmul.f32 %v1033_v24, %v1215_v21 }
  0xe2   : > { %v456_v27 = vpop.f32.mrf.mxu0  ;;  %v520_v28 = vpop.f32.mrf.mxu1 }
  0xe3   : > { %v611_v29 = vadd.f32 %v1220_v23, %v576_v25  ;;  %v574_v30 = vmul.f32 %v1215_v21, %v456_v27  ;;  %v627_v31 = vadd.f32 %v1220_v23, %v592_v26  ;;  %v590_v32 = vmul.f32 %v1215_v21, %v520_v28 }
  0xe4   : > { %v1018_v33 = vpop.f32.mrf.mxu0  ;;  %v1034_v34 = vpop.f32.mrf.mxu1 }
  0xe5   : > { %v639_v35 = vmax.f32 %v611_v29, 0.0  ;;  %v609_v36 = vadd.f32 %v1220_v23, %v574_v30  ;;  %v655_v37 = vmax.f32 %v627_v31, 0.0  ;;  %v577_v38 = vmul.f32 %v1018_v33, %v1215_v21 }
  0xe6   : > { %v625_v39 = vadd.f32 %v1220_v23, %v590_v32  ;;  %v459_v40 = vpop.f32.mrf.mxu0  ;;  %v593_v41 = vmul.f32 %v1034_v34, %v1215_v21  ;;  %v523_v42 = vpop.f32.mrf.mxu1 }
  0xe7   : > { %v963_v43 = vpack.c.bf16 %v639_v35, %v639_v35  ;;  %v637_v44 = vmax.f32 %v609_v36, 0.0  ;;  %v979_v45 = vpack.c.bf16 %v655_v37, %v655_v37  ;;  %v612_v46 = vadd.f32 %v1220_v23, %v577_v38 }
  0xe8   : > { %v653_v47 = vmax.f32 %v625_v39, 0.0  ;;  %v575_v48 = vmul.f32 %v1215_v21, %v459_v40  ;;  %v628_v49 = vadd.f32 %v1220_v23, %v593_v41  ;;  %v1021_v50 = vpop.f32.mrf.mxu0  ;;  %v591_v51 = vmul.f32 %v1215_v21, %v523_v42  ;;  %v1037_v52 = vpop.f32.mrf.mxu1 }
  0xe9   : > { %780 = vst.msk [vmem:[%s1235_s12 + $0x8] sm:$0xf] %vm777_vm2, %v963_v43  ;;  %v961_v53 = vpack.c.bf16 %v637_v44, %v637_v44  ;;  %796 = vst.msk [vmem:[%s1235_s12 + $0x48] sm:$0xf] %vm777_vm2, %v979_v45  ;;  %v640_v54 = vmax.f32 %v612_v46, 0.0  ;;  %v580_v55 = vmul.f32 %v1021_v50, %v1215_v21  ;;  %v596_v56 = vmul.f32 %v1037_v52, %v1215_v21 }
  0xea   : > { %v977_v57 = vpack.c.bf16 %v653_v47, %v653_v47  ;;  %v610_v58 = vadd.f32 %v1220_v23, %v575_v48  ;;  %v656_v59 = vmax.f32 %v628_v49, 0.0  ;;  %v626_v60 = vadd.f32 %v1220_v23, %v591_v51  ;;  %v472_v61 = vpop.f32.mrf.mxu0  ;;  %v536_v62 = vpop.f32.mrf.mxu1 }
  0xeb   : > { %778 = vst.msk [vmem:[%s1235_s12] sm:$0xf] %vm777_vm2, %v961_v53  ;;  %v964_v63 = vpack.c.bf16 %v640_v54, %v640_v54  ;;  %v615_v0 = vadd.f32 %v1220_v23, %v580_v55  ;;  %v578_v1 = vmul.f32 %v1215_v21, %v472_v61  ;;  %v631_v2 = vadd.f32 %v1220_v23, %v596_v56 }
  0xec   : > { %794 = vst.msk [vmem:[%s1235_s12 + $0x40] sm:$0xf] %vm777_vm2, %v977_v57  ;;  %v638_v3 = vmax.f32 %v610_v58, 0.0  ;;  %v980_v4 = vpack.c.bf16 %v656_v59, %v656_v59  ;;  %v654_v5 = vmax.f32 %v626_v60, 0.0  ;;  %v1022_v6 = vpop.f32.mrf.mxu0  ;;  %v594_v7 = vmul.f32 %v1215_v21, %v536_v62  ;;  %v1038_v8 = vpop.f32.mrf.mxu1 }
  0xed   : > { %781 = vst.msk [vmem:[%s1235_s12 + $0xc] sm:$0xf] %vm777_vm2, %v964_v63  ;;  %v643_v9 = vmax.f32 %v615_v0, 0.0  ;;  %v613_v10 = vadd.f32 %v1220_v23, %v578_v1  ;;  %v659_v11 = vmax.f32 %v631_v2, 0.0  ;;  %v581_v12 = vmul.f32 %v1022_v6, %v1215_v21 }
  0xee   : > { %v962_v13 = vpack.c.bf16 %v638_v3, %v638_v3  ;;  %797 = vst.msk [vmem:[%s1235_s12 + $0x4c] sm:$0xf] %vm777_vm2, %v980_v4  ;;  %v978_v14 = vpack.c.bf16 %v654_v5, %v654_v5  ;;  %v629_v15 = vadd.f32 %v1220_v23, %v594_v7  ;;  %v475_v16 = vpop.f32.mrf.mxu0  ;;  %v597_v17 = vmul.f32 %v1038_v8, %v1215_v21  ;;  %v539_v18 = vpop.f32.mrf.mxu1 }
  0xef   : > { %v967_v19 = vpack.c.bf16 %v643_v9, %v643_v9  ;;  %v641_v20 = vmax.f32 %v613_v10, 0.0  ;;  %v983_v22 = vpack.c.bf16 %v659_v11, %v659_v11  ;;  %v616_v24 = vadd.f32 %v1220_v23, %v581_v12 }
  0xf0   : > { %779 = vst.msk [vmem:[%s1235_s12 + $0x4] sm:$0xf] %vm777_vm2, %v962_v13  ;;  %795 = vst.msk [vmem:[%s1235_s12 + $0x44] sm:$0xf] %vm777_vm2, %v978_v14  ;;  %v657_v25 = vmax.f32 %v629_v15, 0.0  ;;  %v579_v26 = vmul.f32 %v1215_v21, %v475_v16  ;;  %v632_v27 = vadd.f32 %v1220_v23, %v597_v17  ;;  %v1025_v28 = vpop.f32.mrf.mxu0  ;;  %v595_v29 = vmul.f32 %v1215_v21, %v539_v18  ;;  %v1041_v30 = vpop.f32.mrf.mxu1 }
  0xf1   : > { %784 = vst.msk [vmem:[%s1235_s12 + $0x18] sm:$0xf] %vm777_vm2, %v967_v19  ;;  %v965_v31 = vpack.c.bf16 %v641_v20, %v641_v20  ;;  %800 = vst.msk [vmem:[%s1235_s12 + $0x58] sm:$0xf] %vm777_vm2, %v983_v22  ;;  %v644_v32 = vmax.f32 %v616_v24, 0.0  ;;  %v584_v33 = vmul.f32 %v1025_v28, %v1215_v21  ;;  %v600_v34 = vmul.f32 %v1041_v30, %v1215_v21 }
  0xf2   : > { %v981_v35 = vpack.c.bf16 %v657_v25, %v657_v25  ;;  %v614_v36 = vadd.f32 %v1220_v23, %v579_v26  ;;  %v660_v37 = vmax.f32 %v632_v27, 0.0  ;;  %v630_v38 = vadd.f32 %v1220_v23, %v595_v29  ;;  %v488_v39 = vpop.f32.mrf.mxu0  ;;  %v552_v40 = vpop.f32.mrf.mxu1 }
  0xf3   : > { %782 = vst.msk [vmem:[%s1235_s12 + $0x10] sm:$0xf] %vm777_vm2, %v965_v31  ;;  %v968_v41 = vpack.c.bf16 %v644_v32, %v644_v32  ;;  %v619_v42 = vadd.f32 %v1220_v23, %v584_v33  ;;  %v582_v43 = vmul.f32 %v1215_v21, %v488_v39  ;;  %v635_v44 = vadd.f32 %v1220_v23, %v600_v34 }
  0xf4   : > { %798 = vst.msk [vmem:[%s1235_s12 + $0x50] sm:$0xf] %vm777_vm2, %v981_v35  ;;  %v642_v45 = vmax.f32 %v614_v36, 0.0  ;;  %v984_v46 = vpack.c.bf16 %v660_v37, %v660_v37  ;;  %v658_v47 = vmax.f32 %v630_v38, 0.0  ;;  %v1026_v48 = vpop.f32.mrf.mxu0  ;;  %v598_v49 = vmul.f32 %v1215_v21, %v552_v40  ;;  %v1042_v50 = vpop.f32.mrf.mxu1 }
  0xf5   : > { %785 = vst.msk [vmem:[%s1235_s12 + $0x1c] sm:$0xf] %vm777_vm2, %v968_v41  ;;  %v647_v51 = vmax.f32 %v619_v42, 0.0  ;;  %v617_v52 = vadd.f32 %v1220_v23, %v582_v43  ;;  %v663_v53 = vmax.f32 %v635_v44, 0.0  ;;  %v585_v54 = vmul.f32 %v1026_v48, %v1215_v21 }
  0xf6   : > { %v966_v55 = vpack.c.bf16 %v642_v45, %v642_v45  ;;  %801 = vst.msk [vmem:[%s1235_s12 + $0x5c] sm:$0xf] %vm777_vm2, %v984_v46  ;;  %v982_v56 = vpack.c.bf16 %v658_v47, %v658_v47  ;;  %v633_v57 = vadd.f32 %v1220_v23, %v598_v49  ;;  %v491_v58 = vpop.f32.mrf.mxu0  ;;  %v601_v59 = vmul.f32 %v1042_v50, %v1215_v21  ;;  %v555_v60 = vpop.f32.mrf.mxu1 }
  0xf7   : > { %v971_v61 = vpack.c.bf16 %v647_v51, %v647_v51  ;;  %v645_v62 = vmax.f32 %v617_v52, 0.0  ;;  %v987_v63 = vpack.c.bf16 %v663_v53, %v663_v53  ;;  %v620_v0 = vadd.f32 %v1220_v23, %v585_v54 }
  0xf8   : > { %783 = vst.msk [vmem:[%s1235_s12 + $0x14] sm:$0xf] %vm777_vm2, %v966_v55  ;;  %799 = vst.msk [vmem:[%s1235_s12 + $0x54] sm:$0xf] %vm777_vm2, %v982_v56  ;;  %v661_v1 = vmax.f32 %v633_v57, 0.0  ;;  %v583_v2 = vmul.f32 %v1215_v21, %v491_v58  ;;  %v636_v3 = vadd.f32 %v1220_v23, %v601_v59  ;;  %v1029_v4 = vpop.f32.mrf.mxu0  ;;  %v599_v5 = vmul.f32 %v1215_v21, %v555_v60 }
  0xf9   : > { %788 = vst.msk [vmem:[%s1235_s12 + $0x28] sm:$0xf] %vm777_vm2, %v971_v61  ;;  %v969_v6 = vpack.c.bf16 %v645_v62, %v645_v62  ;;  %804 = vst.msk [vmem:[%s1235_s12 + $0x68] sm:$0xf] %vm777_vm2, %v987_v63  ;;  %v648_v7 = vmax.f32 %v620_v0, 0.0  ;;  %v588_v8 = vmul.f32 %v1029_v4, %v1215_v21 }
  0xfa   : > { %v985_v9 = vpack.c.bf16 %v661_v1, %v661_v1  ;;  %v618_v10 = vadd.f32 %v1220_v23, %v583_v2  ;;  %v664_v11 = vmax.f32 %v636_v3, 0.0  ;;  %v634_v12 = vadd.f32 %v1220_v23, %v599_v5  ;;  %v504_v13 = vpop.f32.mrf.mxu0 }
  0xfb   : > { %786 = vst.msk [vmem:[%s1235_s12 + $0x20] sm:$0xf] %vm777_vm2, %v969_v6  ;;  %v972_v14 = vpack.c.bf16 %v648_v7, %v648_v7  ;;  %v623_v15 = vadd.f32 %v1220_v23, %v588_v8  ;;  %v586_v16 = vmul.f32 %v1215_v21, %v504_v13 }
  0xfc   : > { %802 = vst.msk [vmem:[%s1235_s12 + $0x60] sm:$0xf] %vm777_vm2, %v985_v9  ;;  %v646_v17 = vmax.f32 %v618_v10, 0.0  ;;  %v988_v18 = vpack.c.bf16 %v664_v11, %v664_v11  ;;  %v662_v19 = vmax.f32 %v634_v12, 0.0  ;;  %v1030_v20 = vpop.f32.mrf.mxu0 }
  0xfd   : > { %789 = vst.msk [vmem:[%s1235_s12 + $0x2c] sm:$0xf] %vm777_vm2, %v972_v14  ;;  %v651_v22 = vmax.f32 %v623_v15, 0.0  ;;  %v621_v24 = vadd.f32 %v1220_v23, %v586_v16  ;;  %v589_v25 = vmul.f32 %v1030_v20, %v1215_v21 }
  0xfe   : > { %v970_v26 = vpack.c.bf16 %v646_v17, %v646_v17  ;;  %805 = vst.msk [vmem:[%s1235_s12 + $0x6c] sm:$0xf] %vm777_vm2, %v988_v18  ;;  %v986_v27 = vpack.c.bf16 %v662_v19, %v662_v19  ;;  %v507_v28 = vpop.f32.mrf.mxu0 }
  0xff   : > { %v975_v29 = vpack.c.bf16 %v651_v22, %v651_v22  ;;  %v649_v30 = vmax.f32 %v621_v24, 0.0  ;;  %v624_v31 = vadd.f32 %v1220_v23, %v589_v25  ;;  %v587_v32 = vmul.f32 %v1215_v21, %v507_v28 }
 0x100   : > { %787 = vst.msk [vmem:[%s1235_s12 + $0x24] sm:$0xf] %vm777_vm2, %v970_v26  ;;  %803 = vst.msk [vmem:[%s1235_s12 + $0x64] sm:$0xf] %vm777_vm2, %v986_v27 }
 0x101   : > { %792 = vst.msk [vmem:[%s1235_s12 + $0x38] sm:$0xf] %vm777_vm2, %v975_v29  ;;  %v973_v33 = vpack.c.bf16 %v649_v30, %v649_v30  ;;  %v652_v34 = vmax.f32 %v624_v31, 0.0  ;;  %v622_v35 = vadd.f32 %v1220_v23, %v587_v32 }
 0x103   : > { %790 = vst.msk [vmem:[%s1235_s12 + $0x30] sm:$0xf] %vm777_vm2, %v973_v33  ;;  %v976_v36 = vpack.c.bf16 %v652_v34, %v652_v34  ;;  %v650_v37 = vmax.f32 %v622_v35, 0.0 }
 0x105   : > { %793 = vst.msk [vmem:[%s1235_s12 + $0x3c] sm:$0xf] %vm777_vm2, %v976_v36  ;;  %v974_v38 = vpack.c.bf16 %v650_v37, %v650_v37 }
 0x107   : > { %791 = vst.msk [vmem:[%s1235_s12 + $0x34] sm:$0xf] %vm777_vm2, %v974_v38 }
 0x108 PF: > { %s14_s17 = sadd.s32 1, %s1116_s17   ;;  %s1355_s15 = smov %s1112_s16 }
 0x109   : > { %p11_p5 = scmp.ge.s32.totalorder %s14_s17, 4   ;;  %s1356_s16 = smov %s1358_s18 }
 0x10b   :  { %13 = sbr.rel (!%p11_p5) target bundleno = 2 (0x2), region = 69 }

</bundles_post_ra>
